<compile_context>
chip_gen: v5e
topology: v5e:2x2
jax: 0.10.0
libtpu: 0.0.40
codegen_flags: <defaults>
</compile_context>

<pallas_src>
import functools

import jax
import jax.numpy as jnp
from jax.experimental import pallas as pl
from jax.experimental.pallas import tpu as pltpu


# --------------------------------------------------------------------------
# Kernel
# --------------------------------------------------------------------------
def _mlp_kernel(x_ref, wgu_ref, wd_ref, o_ref, acc_ref, *, tile_h):
    # x_ref:   [tile_s, in_features]        (compute dtype)
    # wgu_ref: [in_features, 2*tile_h]      (gate tile | up tile, lane-packed)
    # wd_ref:  [tile_h, in_features]
    # o_ref:   [tile_s, in_features]
    # acc_ref: [tile_s, in_features] f32 scratch accumulator
    h = pl.program_id(1)

    x = x_ref[...]
    # One fused MXU matmul covering both gate and up projections of this tile.
    gu = jnp.dot(x, wgu_ref[...], preferred_element_type=jnp.float32)
    gate = gu[:, :tile_h]
    up = gu[:, tile_h:]
    # SiluAndMul in f32 (v5e has no bf16 VPU/EUP).
    act = (gate * jax.nn.sigmoid(gate)) * up
    # Partial down-projection for this hidden tile (f32 accumulation).
    part = jnp.dot(act.astype(wd_ref.dtype), wd_ref[...],
                   preferred_element_type=jnp.float32)

    @pl.when(h == 0)
    def _():
        acc_ref[...] = part          # direct write: no zero-init pass

    @pl.when(h != 0)
    def _():
        acc_ref[...] += part

    @pl.when(h == pl.num_programs(1) - 1)
    def _():
        o_ref[...] = acc_ref[...].astype(o_ref.dtype)


# --------------------------------------------------------------------------
# Tiling helpers
# --------------------------------------------------------------------------
def _device_vmem_capacity_bytes():
    try:
        return int(pltpu.get_tpu_info().vmem_capacity_bytes)
    except Exception:
        return 64 << 20      # conservative fallback (v7x per-TC VMEM)


def _select_tile_h(hidden, tile_h):
    if tile_h >= hidden:
        return hidden                          # full-dim block: always legal
    return max(128, (tile_h // 128) * 128)     # lane-aligned


def _select_tile_s(S, tile_s):
    if tile_s >= S:
        return S                               # full-dim block: always legal
    if tile_s >= 256:
        return (tile_s // 256) * 256           # match 256-wide MXU passes
    return max(16, (tile_s // 16) * 16)        # sublane-aligned (bf16-safe)


# --------------------------------------------------------------------------
# One-time weight packing (hoisted out of the per-call path)
# --------------------------------------------------------------------------
def pack_glm4v_mlp_weights(w_gate_up, w_down, *, tile_h=1024,
                           compute_dtype=jnp.bfloat16):
    """w_gate_up: [2*hidden, in]  (PyTorch nn.Linear y = x @ W^T convention)
       w_down:    [in, hidden]
       Returns (wgu_packed [in, 2*hidden_p], wd_t [hidden_p, in], tile_h)."""
    two_hidden, in_features = w_gate_up.shape
    hidden = two_hidden // 2
    assert w_down.shape == (in_features, hidden)

    tile_h = _select_tile_h(hidden, tile_h)
    hidden_p = pl.cdiv(hidden, tile_h) * tile_h
    n_h = hidden_p // tile_h

    wg = w_gate_up[:hidden, :].astype(compute_dtype)   # [hidden, in]
    wu = w_gate_up[hidden:, :].astype(compute_dtype)   # [hidden, in]
    wd = w_down.astype(compute_dtype)                  # [in, hidden]
    pad = hidden_p - hidden
    if pad:
        # Zero padding contributes silu(0)*0 = 0 and zero wd rows -> exact.
        wg = jnp.pad(wg, ((0, pad), (0, 0)))
        wu = jnp.pad(wu, ((0, pad), (0, 0)))
        wd = jnp.pad(wd, ((0, 0), (0, pad)))

    # Per hidden tile h, lane-pack [gate_tile | up_tile] contiguously.
    wg_t = wg.T.reshape(in_features, n_h, tile_h)
    wu_t = wu.T.reshape(in_features, n_h, tile_h)
    wgu = jnp.concatenate([wg_t, wu_t], axis=2).reshape(in_features,
                                                        2 * hidden_p)
    wd_t = wd.T                                        # [hidden_p, in]
    return wgu, wd_t, tile_h


# --------------------------------------------------------------------------
# Pallas call on pre-packed weights
# --------------------------------------------------------------------------
def glm4v_vision_mlp_packed(x, wgu, wd_t, *, tile_h, tile_s=512,
                            out_dtype=None, min_seq_tiles=1):
    """x: [S, in_features]; wgu/wd_t from pack_glm4v_mlp_weights."""
    S, in_features = x.shape
    in2, two_hidden_p = wgu.shape
    hidden_p = two_hidden_p // 2
    assert in2 == in_features
    assert wd_t.shape == (hidden_p, in_features)
    assert hidden_p % tile_h == 0
    n_h = hidden_p // tile_h

    compute_dtype = wgu.dtype
    if out_dtype is None:
        out_dtype = x.dtype
    x_c = x.astype(compute_dtype)

    # On v7x set min_seq_tiles=2 so both TensorCores get seq tiles.
    if min_seq_tiles > 1 and S > 256 * min_seq_tiles:
        max_ts = max(256, pl.cdiv(pl.cdiv(S, min_seq_tiles), 256) * 256)
        tile_s = min(tile_s, max_ts)
    tile_s = _select_tile_s(S, tile_s)

    cbytes = jnp.dtype(compute_dtype).itemsize
    obytes = jnp.dtype(out_dtype).itemsize

    def vmem_estimate(ts):
        return (2 * ts * in_features * cbytes          # x (double-buffered)
                + 2 * in_features * 2 * tile_h * cbytes  # fused gate/up tile
                + 2 * tile_h * in_features * cbytes      # down-proj tile
                + 2 * ts * in_features * obytes          # output tile
                + ts * in_features * 4                   # f32 accumulator
                + ts * 3 * tile_h * 4)                   # gu / act intermediates

    vmem_cap = _device_vmem_capacity_bytes()
    hard_cap = int(vmem_cap * 0.9)                       # leave headroom
    # Shrink tile_s if the double-buffered footprint would not fit (v7x: 64 MiB).
    while vmem_estimate(tile_s) > hard_cap and tile_s > 256:
        tile_s = max(256, (tile_s // 2 // 256) * 256)
    tile_s = _select_tile_s(S, tile_s)

    n_s = pl.cdiv(S, tile_s)

    vmem_limit = int(vmem_estimate(tile_s) * 1.2) + (4 << 20)
    vmem_limit = max(vmem_limit, 16 << 20)
    vmem_limit = min(vmem_limit, hard_cap)

    # Real streaming pattern: weights are re-read once per seq tile.
    cost = pl.CostEstimate(
        flops=int(6 * S * in_features * hidden_p),
        transcendentals=int(S * hidden_p),
        bytes_accessed=int(S * in_features * cbytes
                           + n_s * (wgu.size + wd_t.size) * cbytes
                           + S * in_features * obytes),
    )

    kernel = functools.partial(_mlp_kernel, tile_h=tile_h)

    return pl.pallas_call(
        kernel,
        out_shape=jax.ShapeDtypeStruct((S, in_features), out_dtype),
        grid_spec=pltpu.PrefetchScalarGridSpec(
            num_scalar_prefetch=0,
            grid=(n_s, n_h),
            in_specs=[
                pl.BlockSpec((tile_s, in_features), lambda i, h: (i, 0)),
                pl.BlockSpec((in_features, 2 * tile_h), lambda i, h: (0, h)),
                pl.BlockSpec((tile_h, in_features), lambda i, h: (h, 0)),
            ],
            out_specs=pl.BlockSpec((tile_s, in_features), lambda i, h: (i, 0)),
            scratch_shapes=[pltpu.VMEM((tile_s, in_features), jnp.float32)],
        ),
        compiler_params=pltpu.CompilerParams(
            dimension_semantics=("parallel", "arbitrary"),
            vmem_limit_bytes=vmem_limit,
        ),
        cost_estimate=cost,
    )(x_c, wgu, wd_t)


# --------------------------------------------------------------------------
# Model-load-time constructor (preferred): pack weights once, call many times.
# --------------------------------------------------------------------------
def make_glm4v_vision_mlp(w_gate_up, w_down, *, tile_s=512, tile_h=1024,
                          compute_dtype=jnp.bfloat16, min_seq_tiles=1):
    wgu, wd_t, tile_h = pack_glm4v_mlp_weights(
        w_gate_up, w_down, tile_h=tile_h, compute_dtype=compute_dtype)

    def forward(x):
        return glm4v_vision_mlp_packed(x, wgu, wd_t, tile_h=tile_h,
                                       tile_s=tile_s, out_dtype=x.dtype,
                                       min_seq_tiles=min_seq_tiles)
    return forward


# Convenience one-shot wrapper (packs per call; prefer make_glm4v_vision_mlp
# in production so the packing cost is paid once at model load).
def glm4v_vision_mlp(x, w_gate_up, w_down, *, tile_s=512, tile_h=1024,
                     compute_dtype=None, min_seq_tiles=1):
    if compute_dtype is None:
        compute_dtype = x.dtype
    wgu, wd_t, tile_h = pack_glm4v_mlp_weights(
        w_gate_up, w_down, tile_h=tile_h, compute_dtype=compute_dtype)
    return glm4v_vision_mlp_packed(x, wgu, wd_t, tile_h=tile_h,
                                   tile_s=tile_s, out_dtype=x.dtype,
                                   min_seq_tiles=min_seq_tiles)


def _reference(x, w_gate_up, w_down):
    hidden = w_gate_up.shape[0] // 2
    gu = x @ w_gate_up.T
    gate, up = gu[:, :hidden], gu[:, hidden:]
    h = jax.nn.silu(gate) * up
    return h @ w_down.T


if __name__ == "__main__":
    key = jax.random.PRNGKey(0)

    # ---- test 1: small shapes, f32 compute, tight tolerance ----
    seq, in_features, hidden_features = 8, 32, 64
    k1, k2, k3, key = jax.random.split(key, 4)
    x = jax.random.normal(k1, (seq, in_features), dtype=jnp.float32)
    w_gate_up = jax.random.normal(
        k2, (2 * hidden_features, in_features), dtype=jnp.float32) * 0.05
    w_down = jax.random.normal(
        k3, (in_features, hidden_features), dtype=jnp.float32) * 0.05

    out = jax.block_until_ready(glm4v_vision_mlp(x, w_gate_up, w_down))
    ref = _reference(x, w_gate_up, w_down)
    assert out.shape == (seq, in_features)
    assert jnp.allclose(out, ref, atol=1e-5, rtol=1e-5)

    # ---- test 2: seq + hidden tiling, padding, bf16 compute, hoisted packing ----
    seq2, in2, hid2 = 40, 128, 320
    k1, k2, k3, key = jax.random.split(key, 4)
    x2 = jax.random.normal(k1, (seq2, in2), dtype=jnp.float32)
    wgu2 = jax.random.normal(k2, (2 * hid2, in2), dtype=jnp.float32) * 0.05
    wd2 = jax.random.normal(k3, (in2, hid2), dtype=jnp.float32) * 0.05

    # Weights are packed once at "model load"; the returned fn is the hot path.
    mlp2 = make_glm4v_vision_mlp(wgu2, wd2, tile_s=16, tile_h=128,
                                 compute_dtype=jnp.bfloat16)
    out2 = jax.block_until_ready(mlp2(x2))
    # Reference with the same input-cast to isolate accumulation rounding only.
    ref2 = _reference(x2.astype(jnp.bfloat16).astype(jnp.float32),
                      wgu2.astype(jnp.bfloat16).astype(jnp.float32),
                      wd2.astype(jnp.bfloat16).astype(jnp.float32))
    assert out2.shape == (seq2, in2)
    assert jnp.allclose(out2, ref2, atol=5e-2, rtol=5e-2)

    print("KERNEL_OK")
</pallas_src>

<mosaic_0001>
module attributes {stable_mosaic.version = 11 : i64} {
  func.func @_mlp_kernel(%arg0: i32, %arg1: i32, %arg2: memref<8x32xf32, #tpu.memory_space<vmem>>, %arg3: memref<32x128xf32, #tpu.memory_space<vmem>>, %arg4: memref<64x32xf32, #tpu.memory_space<vmem>>, %arg5: memref<8x32xf32, #tpu.memory_space<vmem>>, %arg6: memref<8x32xf32, #tpu.memory_space<vmem>>) attributes {dimension_semantics = [#tpu.dimension_semantics<parallel>, #tpu.dimension_semantics<arbitrary>], iteration_bounds = array<i64: 1, 1>, scalar_prefetch = 0 : i64, scratch_operands = 1 : i64, tpu.core_type = #tpu.core_type<tc>, window_params = [{transform_indices = @transform_0, window_bounds = array<i64: 8, 32>}, {transform_indices = @transform_1, window_bounds = array<i64: 32, 128>}, {transform_indices = @transform_2, window_bounds = array<i64: 64, 32>}, {transform_indices = @transform_3, window_bounds = array<i64: 8, 32>}]} {
    %c0 = arith.constant 0 : index
    %c0_0 = arith.constant 0 : index
    %0 = vector.load %arg2[%c0, %c0_0] : memref<8x32xf32, #tpu.memory_space<vmem>>, vector<8x32xf32>
    %c0_1 = arith.constant 0 : index
    %c0_2 = arith.constant 0 : index
    %1 = vector.load %arg3[%c0_1, %c0_2] : memref<32x128xf32, #tpu.memory_space<vmem>>, vector<32x128xf32>
    %cst = arith.constant dense<0.000000e+00> : vector<8x128xf32>
    %2 = tpu.matmul %0, %1, %cst {dimension_numbers = #tpu.dot_dimension_numbers<[1], [0], [0], [1], [0, 0, 1, 1], [], []>} : vector<8x32xf32>, vector<32x128xf32>, vector<8x128xf32> -> vector<8x128xf32>
    %3 = vector.extract_strided_slice %2 {offsets = [0, 0], sizes = [8, 64], strides = [1, 1]} : vector<8x128xf32> to vector<8x64xf32>
    %4 = vector.extract_strided_slice %2 {offsets = [0, 64], sizes = [8, 64], strides = [1, 1]} : vector<8x128xf32> to vector<8x64xf32>
    %5 = arith.negf %3 : vector<8x64xf32>
    %6 = math.exp %5 : vector<8x64xf32>
    %cst_3 = arith.constant 1.000000e+00 : f32
    %7 = vector.broadcast %cst_3 : f32 to vector<8x64xf32>
    %8 = arith.addf %7, %6 : vector<8x64xf32>
    %9 = arith.divf %7, %8 : vector<8x64xf32>
    %10 = arith.mulf %3, %9 : vector<8x64xf32>
    %11 = arith.mulf %10, %4 : vector<8x64xf32>
    %c0_4 = arith.constant 0 : index
    %c0_5 = arith.constant 0 : index
    %12 = vector.load %arg4[%c0_4, %c0_5] : memref<64x32xf32, #tpu.memory_space<vmem>>, vector<64x32xf32>
    %cst_6 = arith.constant dense<0.000000e+00> : vector<8x32xf32>
    %13 = tpu.matmul %11, %12, %cst_6 {dimension_numbers = #tpu.dot_dimension_numbers<[1], [0], [0], [1], [0, 0, 1, 1], [], []>} : vector<8x64xf32>, vector<64x32xf32>, vector<8x32xf32> -> vector<8x32xf32>
    %c0_i32 = arith.constant 0 : i32
    %14 = arith.cmpi eq, %arg1, %c0_i32 : i32
    %15 = arith.extui %14 : i1 to i32
    %c0_i32_7 = arith.constant 0 : i32
    %16 = arith.cmpi ne, %15, %c0_i32_7 : i32
    scf.if %16 {
      %c0_12 = arith.constant 0 : index
      %c0_13 = arith.constant 0 : index
      %23 = vector.load %arg6[%c0_12, %c0_13] : memref<8x32xf32, #tpu.memory_space<vmem>>, vector<8x32xf32>
      tpu.vector_store %arg6[%c0_12, %c0_13], %13 {strides = array<i32>} : memref<8x32xf32, #tpu.memory_space<vmem>>, vector<8x32xf32>,
    } else {
    }
    %c0_i32_8 = arith.constant 0 : i32
    %17 = arith.cmpi ne, %arg1, %c0_i32_8 : i32
    %18 = arith.extui %17 : i1 to i32
    %c0_i32_9 = arith.constant 0 : i32
    %19 = arith.cmpi ne, %18, %c0_i32_9 : i32
    scf.if %19 {
      %c0_12 = arith.constant 0 : index
      %c0_13 = arith.constant 0 : index
      %23 = vector.load %arg6[%c0_12, %c0_13] : memref<8x32xf32, #tpu.memory_space<vmem>>, vector<8x32xf32>
      %24 = arith.addf %23, %13 : vector<8x32xf32>
      %c0_14 = arith.constant 0 : index
      %c0_15 = arith.constant 0 : index
      %25 = vector.load %arg6[%c0_14, %c0_15] : memref<8x32xf32, #tpu.memory_space<vmem>>, vector<8x32xf32>
      tpu.vector_store %arg6[%c0_14, %c0_15], %24 {strides = array<i32>} : memref<8x32xf32, #tpu.memory_space<vmem>>, vector<8x32xf32>,
    } else {
    }
    %c0_i32_10 = arith.constant 0 : i32
    %20 = arith.cmpi eq, %arg1, %c0_i32_10 : i32
    %21 = arith.extui %20 : i1 to i32
    %c0_i32_11 = arith.constant 0 : i32
    %22 = arith.cmpi ne, %21, %c0_i32_11 : i32
    scf.if %22 {
      %c0_12 = arith.constant 0 : index
      %c0_13 = arith.constant 0 : index
      %23 = vector.load %arg6[%c0_12, %c0_13] : memref<8x32xf32, #tpu.memory_space<vmem>>, vector<8x32xf32>
      %c0_14 = arith.constant 0 : index
      %c0_15 = arith.constant 0 : index
      %24 = vector.load %arg5[%c0_14, %c0_15] : memref<8x32xf32, #tpu.memory_space<vmem>>, vector<8x32xf32>
      tpu.vector_store %arg5[%c0_14, %c0_15], %23 {strides = array<i32>} : memref<8x32xf32, #tpu.memory_space<vmem>>, vector<8x32xf32>,
    } else {
    }
    return
  }
  func.func @transform_0(%arg0: i32, %arg1: i32) -> (i32, i32) {
    %c0_i32 = arith.constant 0 : i32
    %c0_i32_0 = arith.constant 0 : i32
    return %arg0, %c0_i32 : i32, i32
  }
  func.func @transform_1(%arg0: i32, %arg1: i32) -> (i32, i32) {
    %c0_i32 = arith.constant 0 : i32
    %c0_i32_0 = arith.constant 0 : i32
    return %c0_i32, %arg1 : i32, i32
  }
  func.func @transform_2(%arg0: i32, %arg1: i32) -> (i32, i32) {
    %c0_i32 = arith.constant 0 : i32
    %c0_i32_0 = arith.constant 0 : i32
    return %arg1, %c0_i32 : i32, i32
  }
  func.func @transform_3(%arg0: i32, %arg1: i32) -> (i32, i32) {
    %c0_i32 = arith.constant 0 : i32
    %c0_i32_0 = arith.constant 0 : i32
    return %arg0, %c0_i32 : i32, i32
  }
}

</mosaic_0001>

<bundles_post_ra>
// kernel: tpu_custom_call.1
= control target key start
LH: loop header
LB: loop body
LE: loop exit
PB: predicated region body
PF: predicated region fallthrough
CT: control target
= control target key end

     0   :  { %s236_s0 = inlined_call_operand.vmem [shape: f32[8,32], index: 0, kind: input, shape index: {}]   ;;  %s237_s1 = inlined_call_operand.vmem [shape: f32[32,128], index: 1, kind: input, shape index: {}]   ;;  %s238_s2 = inlined_call_operand.vmem [shape: f32[64,32], index: 2, kind: input, shape index: {}]   ;;  %s239_s3 = inlined_call_operand.hbm [shape: f32[8,32], index: 3, kind: output, shape index: {}]  }
   0x1   :  { %v19_v0 = vld [vmem:[%s237_s1 + $0x18] sm:$0xff]  ;;  %v18_v1 = vld [vmem:[%s237_s1 + $0x10] sm:$0xff] }
   0x2   :  { %36 = vmatpush.msra.mxu0 %v19_v0 }
   0x3   :  { %8 = vsyncpa [#allocation4], 0  ;;  %v17_v2 = vld [vmem:[%s237_s1 + $0x8] sm:$0xff]  ;;  %v16_v3 = vld [vmem:[%s237_s1] sm:$0xff]  ;;  %vm20_vm0 = vcmask 261120   ;;  %vm77_vm5 = vcmask 523264  }
   0x4   :  { %37 = vmatpush.msra.mxu0 %v18_v1  ;;  %v15_v4 = vld [vmem:[%s236_s0] sm:$0xff]  ;;  %v76_v5 = vld [vmem:[%s238_s2 + $0x38] sm:$0xff]  ;;  %v75_v6 = vld [vmem:[%s238_s2 + $0x30] sm:$0xff]  ;;  %s169_s0 = smov 64   ;;  %s125_s13 = sshll.u32 %s239_s3, 4  ;;  %s126_s13 = int_to_ptr.hbm [resolvable:$true] %s125_s13 }
   0x5   :  { %89 = vmatpush.msra.mxu1 %v76_v5  ;;  %v74_v7 = vld [vmem:[%s238_s2 + $0x28] sm:$0xff]  ;;  %v73_v9 = vld [vmem:[%s238_s2 + $0x20] sm:$0xff]  ;;  %v72_v10 = vld [vmem:[%s238_s2 + $0x18] sm:$0xff] }
   0x6   :  { %38 = vmatpush.msra.mxu0 %v17_v2  ;;  %v71_v11 = vld [vmem:[%s238_s2 + $0x10] sm:$0xff]  ;;  %v70_v15 = vld [vmem:[%s238_s2 + $0x8] sm:$0xff]  ;;  %v69_v16 = vld [vmem:[%s238_s2] sm:$0xff]  ;;  %s170_s2 = smov [#allocation3]  }
   0x7   :  { %90 = vmatpush.msra.mxu1 %v75_v6  ;;  %s123_s10 = sshll.u32 %s170_s2, 4  ;;  %s124_s10 = int_to_ptr.vmem [resolvable:$true] %s123_s10 }
   0x8   :  { %39 = vmatpush.msra.mxu0 %v16_v3 }
   0x9   :  { %134 = vmatmul.msk.f32.vlgmr.msra.gmra.mxu0 %vm20_vm0, %v15_v4  ;;  %91 = vmatpush.msra.mxu1 %v74_v7 }
   0xb   :  { %92 = vmatpush.msra.mxu1 %v73_v9 }
   0xd   :  { %93 = vmatpush.msra.mxu1 %v72_v10 }
   0xf   :  { %94 = vmatpush.msra.mxu1 %v71_v11 }
  0x11   :  { %95 = vmatpush.msra.mxu1 %v70_v15 }
  0x13   :  { %96 = vmatpush.msra.mxu1 %v69_v16 }
  0x86   :  { %v41_v8 = vpop.f32.mrf.mxu0 }
  0x87   :  { %65 = vrot.lane.b32.xlu0 %v41_v8, %s169_s0  ;;  %v135_v12 = vmul.f32 -1.442695, %v41_v8 }
  0x89   :  { %139 = vpow2.f32 %v135_v12 }
  0x8f   :  { %v140_v13 = vpop.eup %139 }
  0x90   :  { %v47_v14 = vadd.f32 1.0, %v140_v13 }
  0x92   :  { %141 = vrcp.f32 %v47_v14  ;;  %v59_v22 = vand.u32 2147483648, %v47_v14  ;;  %vm53_vm2 = vweird.f32 %v47_v14  ;;  %v57_v23 = vand.u32 2147483647, %v47_v14 }
  0x94   :  { %v60_v25 = vor.u32 1.1754944e-38, %v59_v22  ;;  %vm58_vm4 = vcmp.eq.f32.partialorder %v57_v23, 8.507059e+37 }
  0x98   :  { %v142_v17 = vpop.eup %141 }
  0x99   :  { %v49_v18 = vmul.f32 %v142_v17, %v47_v14  ;;  %vm54_vm1 = vweird.f32 %v142_v17 }
  0x9a   :  { %vm55_vm3 = vmor %vm53_vm2, %vm54_vm1 }
  0x9b   :  { %v50_v19 = vsub.f32 1.0, %v49_v18 }
  0x9d   :  { %v51_v20 = vmul.f32 %v142_v17, %v50_v19 }
  0x9f   :  { %v52_v21 = vadd.f32 %v142_v17, %v51_v20 }
  0xa1   :  { %v56_v24 = vsel %vm55_vm3, %v142_v17, %v52_v21 }
  0xa2   :  { %v61_v26 = vsel %vm58_vm4, %v60_v25, %v56_v24 }
  0xa3   :  { %v63_v27 = vmul.f32 %v61_v26, %v41_v8 }
  0xf9   :  { %v66_v28 = vpop.permute.xlu0 %65 }
  0xfa   :  { %v68_v29 = vmul.f32 %v66_v28, %v63_v27 }
  0xfc   :  { %136 = vmatmul.msk.f32.vlgmr.msra.gmra.mxu1 %vm77_vm5, %v68_v29 }
 0x179   :  { %v98_v30 = vpop.f32.mrf.mxu1 }
 0x17a   :  { %105 = vst.msk [vmem:[#allocation2] sm:$0xff] %vm20_vm0, %v98_v30 }
 0x181   :  { %v116_v31 = vld [vmem:[#allocation2] sm:$0xff] }
 0x182   :  { %117 = vst.msk [vmem:[#allocation3] sm:$0xff] %vm20_vm0, %v116_v31 }
 0x183   :  { %128 = dma.vmem_to_hbm [thread:$0]  %s124_s10, 128, %s126_s13, [#allocation4]  }
 0x184   :  { %167 = dma.done.wait [#allocation4], 128  }
 0x185   :  { %168 = vsyncadd [#allocation4], 4294967168 }
 0x186   :  { %133 = vsyncpa [#allocation4], 1 }

</bundles_post_ra>
